<compile_context>
chip_gen: v6e
topology: v6e:2x2x1
jax: 0.10.0
libtpu: 0.0.40
codegen_flags: <defaults>
</compile_context>

<pallas_src>
import functools

import jax
import jax.numpy as jnp
from jax.experimental import pallas as pl
from jax.experimental.pallas import tpu as pltpu

_LANE = 128


def _round_up(x, m):
    return (x + m - 1) // m * m


def _sublane_multiple(dtype):
    # sublane tiling requirement: f32 -> 8, bf16 -> 16, int8/fp8 -> 32
    return max(8, 32 // jnp.dtype(dtype).itemsize)


def _tpu_defaults():
    """(num_shards, tile_rows) chosen per TPU generation (safe fallbacks)."""
    try:
        kind = jax.devices()[0].device_kind.lower()
    except Exception:
        kind = ""
    if "v5" in kind:      # 1 TC; 16 MiB default scoped VMEM -> 8 MiB of f32 input buffers
        return 1, 4096
    if "v6" in kind:      # 1 TC; 32 MiB scoped VMEM -> 16 MiB of f32 input buffers
        return 1, 8192
    if "7" in kind:       # v7x: 2 TCs; 32 MiB scoped / 64 MiB physical VMEM
        return 2, 8192
    return 1, 4096        # unknown / older generations: conservative


def _logmse_kernel(x_ref, y_ref, o_ref, acc_ref, *, rows, tile_rows,
                   tiles_per_shard):
    """Accumulates (x-y)^2 into one (8, 128) VMEM accumulator per shard."""
    s = pl.program_id(0)   # shard (parallel across TensorCores on v7x)
    i = pl.program_id(1)   # row-tile within shard (reduction axis)

    @pl.when(i == 0)
    def _():
        acc_ref[...] = jnp.zeros_like(acc_ref)

    # Unclamped global tile index: the index_map clamps the DMA so it never
    # targets a block fully past the array end; the row mask below (driven by
    # the UNCLAMPED index) zeroes any duplicated / out-of-range rows.
    blk = s * tiles_per_shard + i
    row0 = blk * tile_rows

    def _accum(apply_mask):
        d = x_ref[...].astype(jnp.float32) - y_ref[...].astype(jnp.float32)
        sq = d * d
        if apply_mask:
            row_ids = row0 + jax.lax.broadcasted_iota(jnp.int32, sq.shape, 0)
            # jnp.where select semantics: garbage/NaN in masked rows -> 0.
            sq = jnp.where(row_ids < rows, sq, 0.0)
        # Fold (tile_rows, 128) down to one (8, 128) vreg-block of partials.
        acc_ref[...] += sq.reshape(tile_rows // 8, 8, _LANE).sum(axis=0)

    # Interior tiles: mask-free fast path (halves per-element VALU work).
    @pl.when(row0 + tile_rows <= rows)
    def _():
        _accum(False)

    # Edge / overshoot tiles: row-masked path.
    @pl.when(row0 + tile_rows > rows)
    def _():
        _accum(True)

    @pl.when(i == pl.num_programs(1) - 1)
    def _():
        o_ref[...] = acc_ref[...]


def log_mse_loss(x, y, *, tile_rows=None, num_shards=None):
    """Pallas equivalent of torch.log(F.mse_loss(input, target))."""
    assert x.shape == y.shape, "input/target shapes must match"
    n = int(x.size)
    assert n > 0

    auto_shards, auto_rows = _tpu_defaults()
    if num_shards is None:
        num_shards = auto_shards
    if tile_rows is None:
        tile_rows = auto_rows

    xf = x.reshape(-1)
    yf = y.reshape(-1)

    rows = n // _LANE
    tail = n - rows * _LANE

    total = jnp.zeros((), jnp.float32)

    if rows > 0:
        if tail:
            # Ragged case only: split off the <128-element tail (tiny) and run
            # the kernel on the lane-aligned prefix.
            xm = jax.lax.slice(xf, (0,), (rows * _LANE,))
            ym = jax.lax.slice(yf, (0,), (rows * _LANE,))
        else:
            xm, ym = xf, yf
        x2 = xm.reshape(rows, _LANE)
        y2 = ym.reshape(rows, _LANE)

        # Respect dtype sublane tiling and never make the tile (much) bigger
        # than the data.
        sub = max(_sublane_multiple(x2.dtype), _sublane_multiple(y2.dtype))
        tile_rows = max(sub, _round_up(tile_rows, sub))
        tile_rows = min(tile_rows, _round_up(rows, sub))

        total_tiles = pl.cdiv(rows, tile_rows)
        num_shards = max(1, min(num_shards, total_tiles))
        tiles_per_shard = pl.cdiv(total_tiles, num_shards)

        def in_index(s, i):
            # Clamp so the DMA never targets a block entirely past the array
            # end (the kernel's row mask zeroes duplicated / tail rows).
            return (jnp.minimum(s * tiles_per_shard + i, total_tiles - 1), 0)

        kernel = functools.partial(
            _logmse_kernel, rows=rows, tile_rows=tile_rows,
            tiles_per_shard=tiles_per_shard)

        in_bytes = rows * _LANE * (x2.dtype.itemsize + y2.dtype.itemsize)
        partials = pl.pallas_call(
            kernel,
            out_shape=jax.ShapeDtypeStruct((num_shards * 8, _LANE),
                                           jnp.float32),
            grid_spec=pltpu.PrefetchScalarGridSpec(
                num_scalar_prefetch=0,
                grid=(num_shards, tiles_per_shard),
                in_specs=[
                    pl.BlockSpec((tile_rows, _LANE), in_index),
                    pl.BlockSpec((tile_rows, _LANE), in_index),
                ],
                out_specs=pl.BlockSpec((8, _LANE), lambda s, i: (s, 0)),
                scratch_shapes=[pltpu.VMEM((8, _LANE), jnp.float32)],
            ),
            compiler_params=pltpu.CompilerParams(
                dimension_semantics=("parallel", "arbitrary"),
            ),
            cost_estimate=pl.CostEstimate(
                flops=3 * rows * _LANE,
                transcendentals=0,
                bytes_accessed=in_bytes + num_shards * 8 * _LANE * 4,
            ),
        )(x2, y2)
        total = total + jnp.sum(partials, dtype=jnp.float32)

    if tail:
        xt = jax.lax.slice(xf, (rows * _LANE,), (n,)).astype(jnp.float32)
        yt = jax.lax.slice(yf, (rows * _LANE,), (n,)).astype(jnp.float32)
        dt = xt - yt
        total = total + jnp.sum(dt * dt, dtype=jnp.float32)

    return jnp.log(total / n)


if __name__ == "__main__":
    key = jax.random.PRNGKey(0)
    k_in, k_tg = jax.random.split(key)

    # Small NCHW shapes consistent with a generic (input, target) pair.
    shape = (2, 4, 16, 16)
    x = jax.random.normal(k_in, shape, dtype=jnp.float32)
    t = jax.random.normal(k_tg, shape, dtype=jnp.float32)

    loss = log_mse_loss(x, t)
    jax.block_until_ready(loss)

    # Cross-check against pure-JAX reference.
    ref = jnp.log(jnp.mean((x - t) ** 2))
    assert jnp.allclose(loss, ref, rtol=1e-5, atol=1e-6), (loss, ref)

    print("KERNEL_OK")
</pallas_src>

<mosaic_0001>
module attributes {stable_mosaic.version = 11 : i64} {
  func.func @_logmse_kernel(%arg0: i32, %arg1: i32, %arg2: memref<16x128xf32, #tpu.memory_space<vmem>>, %arg3: memref<16x128xf32, #tpu.memory_space<vmem>>, %arg4: memref<8x128xf32, #tpu.memory_space<vmem>>, %arg5: memref<8x128xf32, #tpu.memory_space<vmem>>) attributes {dimension_semantics = [#tpu.dimension_semantics<parallel>, #tpu.dimension_semantics<arbitrary>], iteration_bounds = array<i64: 1, 1>, scalar_prefetch = 0 : i64, scratch_operands = 1 : i64, tpu.core_type = #tpu.core_type<tc>, window_params = [{transform_indices = @transform_0, window_bounds = array<i64: 16, 128>}, {transform_indices = @transform_1, window_bounds = array<i64: 16, 128>}, {transform_indices = @transform_2, window_bounds = array<i64: 8, 128>}]} {
    %c0_i32 = arith.constant 0 : i32
    %0 = arith.cmpi eq, %arg1, %c0_i32 : i32
    %1 = arith.extui %0 : i1 to i32
    %c0_i32_0 = arith.constant 0 : i32
    %2 = arith.cmpi ne, %1, %c0_i32_0 : i32
    scf.if %2 {
      %cst = arith.constant 0.000000e+00 : f32
      %17 = vector.broadcast %cst : f32 to vector<8x128xf32>
      %c0 = arith.constant 0 : index
      %c0_9 = arith.constant 0 : index
      %18 = vector.load %arg5[%c0, %c0_9] : memref<8x128xf32, #tpu.memory_space<vmem>>, vector<8x128xf32>
      tpu.vector_store %arg5[%c0, %c0_9], %17 {strides = array<i32>} : memref<8x128xf32, #tpu.memory_space<vmem>>, vector<8x128xf32>,
    } else {
    }
    %c1_i32 = arith.constant 1 : i32
    %3 = arith.muli %arg0, %c1_i32 : i32
    %4 = arith.addi %3, %arg1 : i32
    %c16_i32 = arith.constant 16 : i32
    %5 = arith.muli %4, %c16_i32 : i32
    %c16_i32_1 = arith.constant 16 : i32
    %6 = arith.addi %5, %c16_i32_1 : i32
    %c16_i32_2 = arith.constant 16 : i32
    %7 = arith.cmpi sle, %6, %c16_i32_2 : i32
    %8 = arith.extui %7 : i1 to i32
    %c0_i32_3 = arith.constant 0 : i32
    %9 = arith.cmpi ne, %8, %c0_i32_3 : i32
    scf.if %9 {
      %c0 = arith.constant 0 : index
      %c0_9 = arith.constant 0 : index
      %17 = vector.load %arg2[%c0, %c0_9] : memref<16x128xf32, #tpu.memory_space<vmem>>, vector<16x128xf32>
      %c0_10 = arith.constant 0 : index
      %c0_11 = arith.constant 0 : index
      %18 = vector.load %arg3[%c0_10, %c0_11] : memref<16x128xf32, #tpu.memory_space<vmem>>, vector<16x128xf32>
      %19 = arith.subf %17, %18 : vector<16x128xf32>
      %20 = arith.mulf %19, %19 : vector<16x128xf32>
      %c0_12 = arith.constant 0 : index
      %c0_13 = arith.constant 0 : index
      %21 = vector.load %arg5[%c0_12, %c0_13] : memref<8x128xf32, #tpu.memory_space<vmem>>, vector<8x128xf32>
      %22 = vector.shape_cast %20 : vector<16x128xf32> to vector<2x8x128xf32>
      %cst = arith.constant dense<0.000000e+00> : vector<8x128xf32>
      %23 = vector.multi_reduction <add>, %22, %cst [0] : vector<2x8x128xf32> to vector<8x128xf32>
      %24 = arith.addf %21, %23 : vector<8x128xf32>
      %c0_14 = arith.constant 0 : index
      %c0_15 = arith.constant 0 : index
      %25 = vector.load %arg5[%c0_14, %c0_15] : memref<8x128xf32, #tpu.memory_space<vmem>>, vector<8x128xf32>
      tpu.vector_store %arg5[%c0_14, %c0_15], %24 {strides = array<i32>} : memref<8x128xf32, #tpu.memory_space<vmem>>, vector<8x128xf32>,
    } else {
    }
    %c16_i32_4 = arith.constant 16 : i32
    %10 = arith.addi %5, %c16_i32_4 : i32
    %c16_i32_5 = arith.constant 16 : i32
    %11 = arith.cmpi sgt, %10, %c16_i32_5 : i32
    %12 = arith.extui %11 : i1 to i32
    %c0_i32_6 = arith.constant 0 : i32
    %13 = arith.cmpi ne, %12, %c0_i32_6 : i32
    scf.if %13 {
      %c0 = arith.constant 0 : index
      %c0_9 = arith.constant 0 : index
      %17 = vector.load %arg2[%c0, %c0_9] : memref<16x128xf32, #tpu.memory_space<vmem>>, vector<16x128xf32>
      %c0_10 = arith.constant 0 : index
      %c0_11 = arith.constant 0 : index
      %18 = vector.load %arg3[%c0_10, %c0_11] : memref<16x128xf32, #tpu.memory_space<vmem>>, vector<16x128xf32>
      %19 = arith.subf %17, %18 : vector<16x128xf32>
      %20 = arith.mulf %19, %19 : vector<16x128xf32>
      %21 = tpu.iota {dimensions = array<i32: 0>} : vector<16x128xi32>
      %22 = vector.broadcast %5 : i32 to vector<16x128xi32>
      %23 = arith.addi %22, %21 : vector<16x128xi32>
      %c16_i32_12 = arith.constant 16 : i32
      %24 = vector.broadcast %c16_i32_12 : i32 to vector<16x128xi32>
      %25 = arith.cmpi slt, %23, %24 : vector<16x128xi32>
      %cst = arith.constant 0.000000e+00 : f32
      %26 = vector.broadcast %cst : f32 to vector<16x128xf32>
      %27 = arith.select %25, %20, %26 : vector<16x128xi1>, vector<16x128xf32>
      %c0_13 = arith.constant 0 : index
      %c0_14 = arith.constant 0 : index
      %28 = vector.load %arg5[%c0_13, %c0_14] : memref<8x128xf32, #tpu.memory_space<vmem>>, vector<8x128xf32>
      %29 = vector.shape_cast %27 : vector<16x128xf32> to vector<2x8x128xf32>
      %cst_15 = arith.constant dense<0.000000e+00> : vector<8x128xf32>
      %30 = vector.multi_reduction <add>, %29, %cst_15 [0] : vector<2x8x128xf32> to vector<8x128xf32>
      %31 = arith.addf %28, %30 : vector<8x128xf32>
      %c0_16 = arith.constant 0 : index
      %c0_17 = arith.constant 0 : index
      %32 = vector.load %arg5[%c0_16, %c0_17] : memref<8x128xf32, #tpu.memory_space<vmem>>, vector<8x128xf32>
      tpu.vector_store %arg5[%c0_16, %c0_17], %31 {strides = array<i32>} : memref<8x128xf32, #tpu.memory_space<vmem>>, vector<8x128xf32>,
    } else {
    }
    %c0_i32_7 = arith.constant 0 : i32
    %14 = arith.cmpi eq, %arg1, %c0_i32_7 : i32
    %15 = arith.extui %14 : i1 to i32
    %c0_i32_8 = arith.constant 0 : i32
    %16 = arith.cmpi ne, %15, %c0_i32_8 : i32
    scf.if %16 {
      %c0 = arith.constant 0 : index
      %c0_9 = arith.constant 0 : index
      %17 = vector.load %arg5[%c0, %c0_9] : memref<8x128xf32, #tpu.memory_space<vmem>>, vector<8x128xf32>
      %c0_10 = arith.constant 0 : index
      %c0_11 = arith.constant 0 : index
      %18 = vector.load %arg4[%c0_10, %c0_11] : memref<8x128xf32, #tpu.memory_space<vmem>>, vector<8x128xf32>
      tpu.vector_store %arg4[%c0_10, %c0_11], %17 {strides = array<i32>} : memref<8x128xf32, #tpu.memory_space<vmem>>, vector<8x128xf32>,
    } else {
    }
    return
  }
  func.func @transform_0(%arg0: i32, %arg1: i32) -> (i32, i32) {
    %c1_i32 = arith.constant 1 : i32
    %0 = arith.muli %arg0, %c1_i32 : i32
    %1 = arith.addi %0, %arg1 : i32
    %c0_i32 = arith.constant 0 : i32
    %2 = arith.minsi %1, %c0_i32 : i32
    %c0_i32_0 = arith.constant 0 : i32
    %c0_i32_1 = arith.constant 0 : i32
    return %2, %c0_i32_0 : i32, i32
  }
  func.func @transform_1(%arg0: i32, %arg1: i32) -> (i32, i32) {
    %c1_i32 = arith.constant 1 : i32
    %0 = arith.muli %arg0, %c1_i32 : i32
    %1 = arith.addi %0, %arg1 : i32
    %c0_i32 = arith.constant 0 : i32
    %2 = arith.minsi %1, %c0_i32 : i32
    %c0_i32_0 = arith.constant 0 : i32
    %c0_i32_1 = arith.constant 0 : i32
    return %2, %c0_i32_0 : i32, i32
  }
  func.func @transform_2(%arg0: i32, %arg1: i32) -> (i32, i32) {
    %c0_i32 = arith.constant 0 : i32
    %c0_i32_0 = arith.constant 0 : i32
    return %arg0, %c0_i32 : i32, i32
  }
}

</mosaic_0001>

<bundles_post_ra>
// kernel: tpu_custom_call.1
= control target key start
LH: loop header
LB: loop body
LE: loop exit
PB: predicated region body
PF: predicated region fallthrough
CT: control target
= control target key end

     0   :  { %7 = vsyncpa [#allocation4], 0  ;;  %s235_s0 = inlined_call_operand.hbm [shape: f32[16,128], index: 0, kind: input, shape index: {}]   ;;  %s236_s1 = inlined_call_operand.hbm [shape: f32[16,128], index: 1, kind: input, shape index: {}]   ;;  %s237_s2 = inlined_call_operand.hbm [shape: f32[8,128], index: 2, kind: output, shape index: {}]  }
   0x1   :  { %8 = vsyncpa [#allocation7], 0 }
   0x2   :  { %9 = vsyncpa [#allocation5], 0  ;;  %s206_s9 = smov [#allocation3]  }
   0x3   :  { %s21_s10 = sshll.u32 %s206_s9, 4  ;;  %s22_s10 = int_to_ptr.vmem [resolvable:$true] %s21_s10 }
   0x4   :  { %s148_s11 = scalar_lea.vmem %s22_s10, 256  ;;  %p153_p1 = scmp.lt.s32.totalorder %s22_s10, %s22_s10 }
   0x5   :  { %p149_p0 = scmp.ne.s32.totalorder %s22_s10, %s148_s11  ;;  %p154_p2 = scmp.lt.s32.totalorder %s148_s11, %s148_s11 }
   0x7   :  { %p155_p3 = por %p154_p2, %p153_p1 }
   0x9   :  { %p156_p4 = pnand %p155_p3, %p149_p0 }
   0xb   :  { %159 = shalt.err (!%p156_p4)
}
   0xc   :  { %s207_s12 = smov 128   ;;  %s208_s13 = smov 8  }
   0xd   :  { %27 = dma.hbm_to_vmem [thread:$0]  %s235_s0, 256, %s22_s10, [#allocation4], %s207_s12, %s207_s12, %s208_s13  }
   0xe   :  { %s209_s16 = smov [#allocation6]  }
   0xf   :  { %s39_s17 = sshll.u32 %s209_s16, 4  ;;  %s40_s17 = int_to_ptr.vmem [resolvable:$true] %s39_s17 }
  0x10   :  { %s168_s18 = scalar_lea.vmem %s40_s17, 256  ;;  %p173_p6 = scmp.lt.s32.totalorder %s40_s17, %s40_s17 }
  0x11   :  { %p169_p5 = scmp.ne.s32.totalorder %s40_s17, %s168_s18  ;;  %p174_p7 = scmp.lt.s32.totalorder %s168_s18, %s168_s18 }
  0x13   :  { %p175_p8 = por %p174_p7, %p173_p6 }
  0x15   :  { %p176_p9 = pnand %p175_p8, %p169_p5 }
  0x17   :  { %179 = shalt.err (!%p176_p9)
}
  0x18   :  { %45 = dma.hbm_to_vmem [thread:$0]  %s236_s1, 256, %s40_s17, [#allocation7], %s207_s12, %s207_s12, %s208_s13  }
  0x19   :  { %200 = dma.done.wait [#allocation4], 256  }
  0x1a   :  { %201 = vsyncadd [#allocation4], 4294967040 }
  0x1b   :  { %202 = dma.done.wait [#allocation7], 256  }
  0x1c   :  { %203 = vsyncadd [#allocation7], 4294967040  ;;  %v72_v0 = vld [vmem:[#allocation3] sm:$0xff]  ;;  %v73_v1 = vld [vmem:[#allocation3 + $0x8] sm:$0xff]  ;;  %s210_s0 = smov [#allocation8]  }
  0x1d   :  { %v74_v2 = vld [vmem:[#allocation6] sm:$0xff]  ;;  %v75_v3 = vld [vmem:[#allocation6 + $0x8] sm:$0xff]  ;;  %s121_s21 = sshll.u32 %s210_s0, 4  ;;  %s122_s21 = int_to_ptr.vmem [resolvable:$true] %s121_s21 }
  0x1e   :  { %v76_v4 = vsub.f32 %v72_v0, %v74_v2  ;;  %v77_v5 = vsub.f32 %v73_v1, %v75_v3  ;;  %s180_s22 = scalar_lea.vmem %s122_s21, 128  ;;  %p185_p11 = scmp.lt.s32.totalorder %s122_s21, %s122_s21 }
  0x1f   :  { %p181_p10 = scmp.ne.s32.totalorder %s122_s21, %s180_s22  ;;  %p186_p12 = scmp.lt.s32.totalorder %s180_s22, %s180_s22 }
  0x20   :  { %v78_v6 = vmul.f32 %v76_v4, %v76_v4  ;;  %v79_v7 = vmul.f32 %v77_v5, %v77_v5 }
  0x21   :  { %p187_p13 = por %p186_p12, %p185_p11 }
  0x22   :  { %v81_v8 = vadd.f32 %v79_v7, %v78_v6 }
  0x23   :  { %p188_p0 = pnand %p187_p13, %p181_p10 }
  0x24   :  { %114 = vst [vmem:[#allocation8] sm:$0xff] %v81_v8 }
  0x25   :  { %191 = shalt.err (!%p188_p0)
}
  0x26   :  { %124 = dma.vmem_to_hbm [thread:$0]  %s122_s21, 128, %s237_s2, [#allocation5]  }
  0x27   :  { %204 = dma.done.wait [#allocation5], 128  }
  0x28   :  { %205 = vsyncadd [#allocation5], 4294967168 }
  0x29   :  { %128 = vsyncpa [#allocation4], 1 }
  0x2a   :  { %129 = vsyncpa [#allocation7], 1 }
  0x2b   :  { %130 = vsyncpa [#allocation5], 1 }

</bundles_post_ra>
